<compile_context>
chip_gen: v7x
topology: tpu7x:2x2x1
jax: 0.10.0
libtpu: 0.0.40
codegen_flags: <defaults>
</compile_context>

<pallas_src>
import functools

import jax
import jax.numpy as jnp
from jax.experimental import pallas as pl
from jax.experimental.pallas import tpu as pltpu


# ----------------------------- Pallas kernel --------------------------------
def _dense_simple_unit_kernel(x_ref, scale_ref, shift_ref, w_ref, y_ref,
                              *, H, W, Cin):
    """One grid step = one image, NC(HW) layout (pixels on the lane axis).

    x_ref     : (1, Cin, H*W)     input image (channels on sublanes, pixels on lanes)
    scale_ref : (Cin, 1)          fused BN scale  = gamma / sqrt(var + eps)
    shift_ref : (Cin, 1)          fused BN shift  = beta - mean * scale
    w_ref     : (Cinc, 9*Cin)     conv weight in im2col order (o, (ky, kx, c))
    y_ref     : (1, Cinc, H*W)    conv output (identity concat done in wrapper)
    """
    HW = H * W
    x = x_ref[0].astype(jnp.float32)                       # (Cin, HW)

    # BatchNorm (inference affine, pre-fused) + ReLU.
    # NOTE: for large DenseNet shapes on v6e/v7x, cast act/w to bf16 here
    # (keep f32 accumulation via preferred_element_type); f32 kept for v5e.
    act = jnp.maximum(x * scale_ref[...] + shift_ref[...], 0.0)

    # Lane-position predicates for the 3x3 zero-padding halo.
    pos = jax.lax.broadcasted_iota(jnp.int32, (1, HW), 1)  # flattened pixel idx
    col = pos % W                                          # pixel column (w coord)

    # im2col: 9 lane-rotated copies of `act` (halo positions zeroed), stacked
    # along the sublane axis.  Shifts are in-register XLU rotations.
    taps = []
    for ky in range(3):
        for kx in range(3):
            off = (ky - 1) * W + (kx - 1)                  # flattened tap offset
            if off == 0:
                shifted = act
            else:
                # shifted[p] = act[(p + off) mod HW]; wrap positions are masked.
                shifted = pltpu.roll(act, (-off) % HW, 1)
            valid = None
            if ky == 0:
                valid = pos >= W                           # needs h - 1 >= 0
            elif ky == 2:
                valid = pos < (H - 1) * W                  # needs h + 1 <  H
            if kx == 0:
                v = col > 0                                # needs w - 1 >= 0
                valid = v if valid is None else (valid & v)
            elif kx == 2:
                v = col < W - 1                            # needs w + 1 <  W
                valid = v if valid is None else (valid & v)
            taps.append(shifted if valid is None
                        else jnp.where(valid, shifted, 0.0))
    patches = jnp.concatenate(taps, axis=0)                # (9*Cin, HW)

    # Single MXU contraction: (Cinc, 9*Cin) @ (9*Cin, HW) -> (Cinc, HW).
    y = jnp.dot(w_ref[...], patches, preferred_element_type=jnp.float32)
    y_ref[0] = y.astype(y_ref.dtype)


# ------------------------------- wrapper -------------------------------------
def dense_simple_unit(x_nchw, gamma, beta, run_mean, run_var, conv_w,
                      eps=1e-5, dropout_rate=0.0):
    """DenseSimpleUnit forward. x_nchw: (N, Cin, H, W); conv_w: (Cinc, Cin, 3, 3)."""
    assert dropout_rate == 0.0  # use_dropout=False (eval-mode dropout is identity anyway)
    N, Cin, H, W = x_nchw.shape
    Cinc = conv_w.shape[0]
    HW = H * W

    # NCHW kept; flatten spatial onto the lane axis (free, contiguous reshape).
    x3 = x_nchw.reshape(N, Cin, HW)

    inv_std = 1.0 / jnp.sqrt(run_var + eps)
    scale = (gamma * inv_std).reshape(Cin, 1).astype(jnp.float32)
    shift = (beta - run_mean * gamma * inv_std).reshape(Cin, 1).astype(jnp.float32)
    # (Cinc, Cin, 3, 3) -> (Cinc, ky, kx, Cin) -> (Cinc, 9*Cin): matches im2col rows.
    w2 = jnp.transpose(conv_w, (0, 2, 3, 1)).reshape(Cinc, 9 * Cin).astype(jnp.float32)

    kernel = functools.partial(_dense_simple_unit_kernel, H=H, W=W, Cin=Cin)

    y = pl.pallas_call(
        kernel,
        out_shape=jax.ShapeDtypeStruct((N, Cinc, HW), x_nchw.dtype),
        grid_spec=pltpu.PrefetchScalarGridSpec(
            num_scalar_prefetch=0,
            grid=(N,),
            in_specs=[
                pl.BlockSpec((1, Cin, HW), lambda n: (n, 0, 0)),
                pl.BlockSpec((Cin, 1), lambda n: (0, 0)),
                pl.BlockSpec((Cin, 1), lambda n: (0, 0)),
                pl.BlockSpec((Cinc, 9 * Cin), lambda n: (0, 0)),
            ],
            out_specs=pl.BlockSpec((1, Cinc, HW), lambda n: (n, 0, 0)),
        ),
        compiler_params=pltpu.CompilerParams(
            dimension_semantics=("parallel",)),
    )(x3, scale, shift, w2)

    # Identity half of the DenseNet concat is a pure memcpy -> done outside the kernel.
    return jnp.concatenate([x_nchw, y.reshape(N, Cinc, H, W)], axis=1)


# --------------------------- pure-JAX reference -------------------------------
def _reference(x, gamma, beta, run_mean, run_var, conv_w, eps=1e-5):
    b = lambda v: v[None, :, None, None]
    xn = (x - b(run_mean)) / jnp.sqrt(b(run_var) + eps) * b(gamma) + b(beta)
    a = jnp.maximum(xn, 0.0)
    y = jax.lax.conv_general_dilated(
        a, conv_w, window_strides=(1, 1), padding=((1, 1), (1, 1)),
        dimension_numbers=("NCHW", "OIHW", "NCHW"))
    return jnp.concatenate([x, y], axis=1)


if __name__ == "__main__":
    # Shapes consistent with the module: in_channels=4, out_channels=8 -> inc=4.
    N, Cin, H, W = 2, 4, 16, 16
    Cout_total = 8
    Cinc = Cout_total - Cin

    key = jax.random.PRNGKey(0)
    kx, kw, kg, kb, km, kv = jax.random.split(key, 6)

    x = jax.random.normal(kx, (N, Cin, H, W), dtype=jnp.float32)
    conv_w = jax.random.normal(kw, (Cinc, Cin, 3, 3), dtype=jnp.float32) * 0.1
    gamma = 1.0 + 0.1 * jax.random.normal(kg, (Cin,), dtype=jnp.float32)
    beta = 0.1 * jax.random.normal(kb, (Cin,), dtype=jnp.float32)
    run_mean = 0.1 * jax.random.normal(km, (Cin,), dtype=jnp.float32)
    run_var = jnp.abs(jax.random.normal(kv, (Cin,), dtype=jnp.float32)) + 0.5

    out = dense_simple_unit(x, gamma, beta, run_mean, run_var, conv_w)
    out = jax.block_until_ready(out)

    ref = _reference(x, gamma, beta, run_mean, run_var, conv_w)
    assert out.shape == (N, Cout_total, H, W)
    assert jnp.allclose(out, ref, atol=1e-4, rtol=1e-4)

    print("KERNEL_OK")
</pallas_src>

<mosaic_0001>
module attributes {stable_mosaic.version = 11 : i64} {
  func.func @_dense_simple_unit_kernel(%arg0: i32, %arg1: memref<1x4x256xf32, #tpu.memory_space<vmem>>, %arg2: memref<4x1xf32, #tpu.memory_space<vmem>>, %arg3: memref<4x1xf32, #tpu.memory_space<vmem>>, %arg4: memref<4x36xf32, #tpu.memory_space<vmem>>, %arg5: memref<1x4x256xf32, #tpu.memory_space<vmem>>) attributes {dimension_semantics = [#tpu.dimension_semantics<parallel>], iteration_bounds = array<i64: 2>, scalar_prefetch = 0 : i64, scratch_operands = 0 : i64, tpu.core_type = #tpu.core_type<tc>, window_params = [{transform_indices = @transform_0, window_bounds = array<i64: 1, 4, 256>}, {pipeline_mode = #tpu.pipeline_mode<synchronous>, transform_indices = @transform_1, window_bounds = array<i64: 4, 1>}, {pipeline_mode = #tpu.pipeline_mode<synchronous>, transform_indices = @transform_2, window_bounds = array<i64: 4, 1>}, {pipeline_mode = #tpu.pipeline_mode<synchronous>, transform_indices = @transform_3, window_bounds = array<i64: 4, 36>}, {transform_indices = @transform_4, window_bounds = array<i64: 1, 4, 256>}]} {
    %c0 = arith.constant 0 : index
    %c0_0 = arith.constant 0 : index
    %c0_1 = arith.constant 0 : index
    %0 = vector.load %arg1[%c0, %c0_0, %c0_1] : memref<1x4x256xf32, #tpu.memory_space<vmem>>, vector<1x4x256xf32>
    %1 = vector.shape_cast %0 : vector<1x4x256xf32> to vector<4x256xf32>
    %c0_2 = arith.constant 0 : index
    %c0_3 = arith.constant 0 : index
    %2 = vector.load %arg2[%c0_2, %c0_3] : memref<4x1xf32, #tpu.memory_space<vmem>>, vector<4x1xf32>
    %3 = vector.broadcast %2 : vector<4x1xf32> to vector<4x256xf32>
    %4 = arith.mulf %1, %3 : vector<4x256xf32>
    %c0_4 = arith.constant 0 : index
    %c0_5 = arith.constant 0 : index
    %5 = vector.load %arg3[%c0_4, %c0_5] : memref<4x1xf32, #tpu.memory_space<vmem>>, vector<4x1xf32>
    %6 = vector.broadcast %5 : vector<4x1xf32> to vector<4x256xf32>
    %7 = arith.addf %4, %6 : vector<4x256xf32>
    %cst = arith.constant 0.000000e+00 : f32
    %8 = vector.broadcast %cst : f32 to vector<4x256xf32>
    %9 = arith.maximumf %7, %8 : vector<4x256xf32>
    %10 = tpu.iota {dimensions = array<i32: 1>} : vector<1x256xi32>
    %c16_i32 = arith.constant 16 : i32
    %c0_i32 = arith.constant 0 : i32
    %11 = arith.cmpi eq, %c16_i32, %c0_i32 : i32
    %c1_i32 = arith.constant 1 : i32
    %12 = arith.select %11, %c1_i32, %c16_i32 : i32
    %13 = vector.broadcast %12 : i32 to vector<1x256xi32>
    %14 = arith.remsi %10, %13 : vector<1x256xi32>
    %c0_i32_6 = arith.constant 0 : i32
    %15 = vector.broadcast %c0_i32_6 : i32 to vector<1x256xi32>
    %16 = arith.cmpi ne, %14, %15 : vector<1x256xi32>
    %c0_i32_7 = arith.constant 0 : i32
    %17 = vector.broadcast %c0_i32_7 : i32 to vector<1x256xi32>
    %18 = arith.cmpi slt, %14, %17 : vector<1x256xi32>
    %c0_i32_8 = arith.constant 0 : i32
    %19 = arith.cmpi slt, %12, %c0_i32_8 : i32
    %20 = vector.broadcast %19 : i1 to vector<1x256xi1>
    %21 = vector.broadcast %20 : vector<1x256xi1> to vector<1x256xi1>
    %22 = arith.xori %18, %21 : vector<1x256xi1>
    %23 = arith.andi %22, %16 : vector<1x256xi1>
    %24 = vector.broadcast %12 : i32 to vector<1x256xi32>
    %25 = arith.addi %14, %24 : vector<1x256xi32>
    %26 = arith.select %23, %25, %14 : vector<1x256xi1>, vector<1x256xi32>
    %c17_i32 = arith.constant 17 : i32
    %27 = tpu.dynamic_rotate %9 by %c17_i32 dim 1 : vector<4x256xf32>, i32 -> vector<4x256xf32>
    %c16_i32_9 = arith.constant 16 : i32
    %28 = vector.broadcast %c16_i32_9 : i32 to vector<1x256xi32>
    %29 = arith.cmpi sge, %10, %28 : vector<1x256xi32>
    %c0_i32_10 = arith.constant 0 : i32
    %30 = vector.broadcast %c0_i32_10 : i32 to vector<1x256xi32>
    %31 = arith.cmpi sgt, %26, %30 : vector<1x256xi32>
    %32 = arith.andi %29, %31 : vector<1x256xi1>
    %cst_11 = arith.constant 0.000000e+00 : f32
    %33 = vector.shape_cast %32 : vector<1x256xi1> to vector<1x256xi1>
    %34 = vector.broadcast %33 : vector<1x256xi1> to vector<4x256xi1>
    %35 = vector.broadcast %cst_11 : f32 to vector<4x256xf32>
    %36 = arith.select %34, %27, %35 : vector<4x256xi1>, vector<4x256xf32>
    %c16_i32_12 = arith.constant 16 : i32
    %37 = tpu.dynamic_rotate %9 by %c16_i32_12 dim 1 : vector<4x256xf32>, i32 -> vector<4x256xf32>
    %c16_i32_13 = arith.constant 16 : i32
    %38 = vector.broadcast %c16_i32_13 : i32 to vector<1x256xi32>
    %39 = arith.cmpi sge, %10, %38 : vector<1x256xi32>
    %cst_14 = arith.constant 0.000000e+00 : f32
    %40 = vector.shape_cast %39 : vector<1x256xi1> to vector<1x256xi1>
    %41 = vector.broadcast %40 : vector<1x256xi1> to vector<4x256xi1>
    %42 = vector.broadcast %cst_14 : f32 to vector<4x256xf32>
    %43 = arith.select %41, %37, %42 : vector<4x256xi1>, vector<4x256xf32>
    %c15_i32 = arith.constant 15 : i32
    %44 = tpu.dynamic_rotate %9 by %c15_i32 dim 1 : vector<4x256xf32>, i32 -> vector<4x256xf32>
    %c16_i32_15 = arith.constant 16 : i32
    %45 = vector.broadcast %c16_i32_15 : i32 to vector<1x256xi32>
    %46 = arith.cmpi sge, %10, %45 : vector<1x256xi32>
    %c15_i32_16 = arith.constant 15 : i32
    %47 = vector.broadcast %c15_i32_16 : i32 to vector<1x256xi32>
    %48 = arith.cmpi slt, %26, %47 : vector<1x256xi32>
    %49 = arith.andi %46, %48 : vector<1x256xi1>
    %cst_17 = arith.constant 0.000000e+00 : f32
    %50 = vector.shape_cast %49 : vector<1x256xi1> to vector<1x256xi1>
    %51 = vector.broadcast %50 : vector<1x256xi1> to vector<4x256xi1>
    %52 = vector.broadcast %cst_17 : f32 to vector<4x256xf32>
    %53 = arith.select %51, %44, %52 : vector<4x256xi1>, vector<4x256xf32>
    %c1_i32_18 = arith.constant 1 : i32
    %54 = tpu.dynamic_rotate %9 by %c1_i32_18 dim 1 : vector<4x256xf32>, i32 -> vector<4x256xf32>
    %c0_i32_19 = arith.constant 0 : i32
    %55 = vector.broadcast %c0_i32_19 : i32 to vector<1x256xi32>
    %56 = arith.cmpi sgt, %26, %55 : vector<1x256xi32>
    %cst_20 = arith.constant 0.000000e+00 : f32
    %57 = vector.shape_cast %56 : vector<1x256xi1> to vector<1x256xi1>
    %58 = vector.broadcast %57 : vector<1x256xi1> to vector<4x256xi1>
    %59 = vector.broadcast %cst_20 : f32 to vector<4x256xf32>
    %60 = arith.select %58, %54, %59 : vector<4x256xi1>, vector<4x256xf32>
    %c255_i32 = arith.constant 255 : i32
    %61 = tpu.dynamic_rotate %9 by %c255_i32 dim 1 : vector<4x256xf32>, i32 -> vector<4x256xf32>
    %c15_i32_21 = arith.constant 15 : i32
    %62 = vector.broadcast %c15_i32_21 : i32 to vector<1x256xi32>
    %63 = arith.cmpi slt, %26, %62 : vector<1x256xi32>
    %cst_22 = arith.constant 0.000000e+00 : f32
    %64 = vector.shape_cast %63 : vector<1x256xi1> to vector<1x256xi1>
    %65 = vector.broadcast %64 : vector<1x256xi1> to vector<4x256xi1>
    %66 = vector.broadcast %cst_22 : f32 to vector<4x256xf32>
    %67 = arith.select %65, %61, %66 : vector<4x256xi1>, vector<4x256xf32>
    %c241_i32 = arith.constant 241 : i32
    %68 = tpu.dynamic_rotate %9 by %c241_i32 dim 1 : vector<4x256xf32>, i32 -> vector<4x256xf32>
    %c240_i32 = arith.constant 240 : i32
    %69 = vector.broadcast %c240_i32 : i32 to vector<1x256xi32>
    %70 = arith.cmpi slt, %10, %69 : vector<1x256xi32>
    %c0_i32_23 = arith.constant 0 : i32
    %71 = vector.broadcast %c0_i32_23 : i32 to vector<1x256xi32>
    %72 = arith.cmpi sgt, %26, %71 : vector<1x256xi32>
    %73 = arith.andi %70, %72 : vector<1x256xi1>
    %cst_24 = arith.constant 0.000000e+00 : f32
    %74 = vector.shape_cast %73 : vector<1x256xi1> to vector<1x256xi1>
    %75 = vector.broadcast %74 : vector<1x256xi1> to vector<4x256xi1>
    %76 = vector.broadcast %cst_24 : f32 to vector<4x256xf32>
    %77 = arith.select %75, %68, %76 : vector<4x256xi1>, vector<4x256xf32>
    %c240_i32_25 = arith.constant 240 : i32
    %78 = tpu.dynamic_rotate %9 by %c240_i32_25 dim 1 : vector<4x256xf32>, i32 -> vector<4x256xf32>
    %c240_i32_26 = arith.constant 240 : i32
    %79 = vector.broadcast %c240_i32_26 : i32 to vector<1x256xi32>
    %80 = arith.cmpi slt, %10, %79 : vector<1x256xi32>
    %cst_27 = arith.constant 0.000000e+00 : f32
    %81 = vector.shape_cast %80 : vector<1x256xi1> to vector<1x256xi1>
    %82 = vector.broadcast %81 : vector<1x256xi1> to vector<4x256xi1>
    %83 = vector.broadcast %cst_27 : f32 to vector<4x256xf32>
    %84 = arith.select %82, %78, %83 : vector<4x256xi1>, vector<4x256xf32>
    %c239_i32 = arith.constant 239 : i32
    %85 = tpu.dynamic_rotate %9 by %c239_i32 dim 1 : vector<4x256xf32>, i32 -> vector<4x256xf32>
    %c240_i32_28 = arith.constant 240 : i32
    %86 = vector.broadcast %c240_i32_28 : i32 to vector<1x256xi32>
    %87 = arith.cmpi slt, %10, %86 : vector<1x256xi32>
    %c15_i32_29 = arith.constant 15 : i32
    %88 = vector.broadcast %c15_i32_29 : i32 to vector<1x256xi32>
    %89 = arith.cmpi slt, %26, %88 : vector<1x256xi32>
    %90 = arith.andi %87, %89 : vector<1x256xi1>
    %cst_30 = arith.constant 0.000000e+00 : f32
    %91 = vector.shape_cast %90 : vector<1x256xi1> to vector<1x256xi1>
    %92 = vector.broadcast %91 : vector<1x256xi1> to vector<4x256xi1>
    %93 = vector.broadcast %cst_30 : f32 to vector<4x256xf32>
    %94 = arith.select %92, %85, %93 : vector<4x256xi1>, vector<4x256xf32>
    %95 = tpu.concatenate %36, %43, %53, %60, %9, %67, %77, %84, %94 in 0 : vector<4x256xf32>, vector<4x256xf32>, vector<4x256xf32>, vector<4x256xf32>, vector<4x256xf32>, vector<4x256xf32>, vector<4x256xf32>, vector<4x256xf32>, vector<4x256xf32> -> vector<36x256xf32>
    %c0_31 = arith.constant 0 : index
    %c0_32 = arith.constant 0 : index
    %96 = vector.load %arg4[%c0_31, %c0_32] : memref<4x36xf32, #tpu.memory_space<vmem>>, vector<4x36xf32>
    %cst_33 = arith.constant dense<0.000000e+00> : vector<4x256xf32>
    %97 = tpu.matmul %96, %95, %cst_33 {dimension_numbers = #tpu.dot_dimension_numbers<[1], [0], [0], [1], [0, 0, 1, 1], [], []>} : vector<4x36xf32>, vector<36x256xf32>, vector<4x256xf32> -> vector<4x256xf32>
    %c0_34 = arith.constant 0 : index
    %c0_35 = arith.constant 0 : index
    %c0_36 = arith.constant 0 : index
    %98 = vector.load %arg5[%c0_34, %c0_35, %c0_36] : memref<1x4x256xf32, #tpu.memory_space<vmem>>, vector<1x4x256xf32>
    %99 = vector.shape_cast %98 : vector<1x4x256xf32> to vector<4x256xf32>
    %100 = vector.shape_cast %97 : vector<4x256xf32> to vector<1x4x256xf32>
    tpu.vector_store %arg5[%c0_34, %c0_35, %c0_36], %100 {strides = array<i32>} : memref<1x4x256xf32, #tpu.memory_space<vmem>>, vector<1x4x256xf32>,
    return
  }
  func.func @transform_0(%arg0: i32) -> (i32, i32, i32) {
    %c0_i32 = arith.constant 0 : i32
    %c0_i32_0 = arith.constant 0 : i32
    %c0_i32_1 = arith.constant 0 : i32
    return %arg0, %c0_i32, %c0_i32_0 : i32, i32, i32
  }
  func.func @transform_1(%arg0: i32) -> (i32, i32) {
    %c0_i32 = arith.constant 0 : i32
    %c0_i32_0 = arith.constant 0 : i32
    %c0_i32_1 = arith.constant 0 : i32
    return %c0_i32, %c0_i32_0 : i32, i32
  }
  func.func @transform_2(%arg0: i32) -> (i32, i32) {
    %c0_i32 = arith.constant 0 : i32
    %c0_i32_0 = arith.constant 0 : i32
    %c0_i32_1 = arith.constant 0 : i32
    return %c0_i32, %c0_i32_0 : i32, i32
  }
  func.func @transform_3(%arg0: i32) -> (i32, i32) {
    %c0_i32 = arith.constant 0 : i32
    %c0_i32_0 = arith.constant 0 : i32
    %c0_i32_1 = arith.constant 0 : i32
    return %c0_i32, %c0_i32_0 : i32, i32
  }
  func.func @transform_4(%arg0: i32) -> (i32, i32, i32) {
    %c0_i32 = arith.constant 0 : i32
    %c0_i32_0 = arith.constant 0 : i32
    %c0_i32_1 = arith.constant 0 : i32
    return %arg0, %c0_i32, %c0_i32_0 : i32, i32, i32
  }
}

</mosaic_0001>

<bundles_post_ra>
// kernel: tpu_custom_call.1
= control target key start
LH: loop header
LB: loop body
LE: loop exit
PB: predicated region body
PF: predicated region fallthrough
CT: control target
= control target key end

     0   :  { %9 = vsyncpa [#allocation3], 0  ;;  %s1164_s0 = inlined_call_operand.hbm [shape: f32[2,4,256], index: 0, kind: input, shape index: {}]   ;;  %s1165_s1 = inlined_call_operand.vmem [shape: f32[4,1], index: 1, kind: input, shape index: {}]   ;;  %s1166_s2 = inlined_call_operand.vmem [shape: f32[4,1], index: 2, kind: input, shape index: {}]   ;;  %s1167_s3 = inlined_call_operand.vmem [shape: f32[4,36], index: 3, kind: input, shape index: {}]   ;;  %s1168_s4 = inlined_call_operand.hbm [shape: f32[2,4,256], index: 4, kind: output, shape index: {}]  }
   0x1   :  { %11 = vsyncpa [#allocation3 + $0x1], 0 }
   0x2   :  { %12 = vsyncpa [#allocation4], 0 }
   0x3   :  { %14 = vsyncpa [#allocation4 + $0x1], 0  ;;  %s855_s15 = smov 0   ;;  %s857_s16 = smov 0  }
   0x4   :  { %s859_s17 = smov 0   ;;  %s861_s18 = smov 0  }
   0x5 LB: > { %s876_s19 = sadd.s32 4294967295, %s815_s18   ;;  %s599_s20 = sadd.s32 4294967294, %s815_s18   ;;  %s815_s18 = sphi %s861_s18, %s1195_s18   ;;  %s811_s17 = sphi %s859_s17, %s1194_s17   ;;  %s807_s16 = sphi %s857_s16, %s1193_s16   ;;  %s803_s15 = sphi %s855_s15, %s1192_s15  }
   0x6   : > { %s880_s21 = sadd.s32 1, %s815_s18   ;;  %s27_s22 = sadd.s32 1, %s811_s17 }
   0x7   : > { %s24_s23 = ssub.s32 %s815_s18, %s880_s21  ;;  %p34_p0 = scmp.ne.s32.totalorder %s811_s17, %s807_s16 }
   0x8   : > { %p25_p1 = scmp.eq.s32.totalorder %s24_s23, 0  ;;  %p35_p2 = scmp.eq.s32.totalorder %s815_s18, 0 }
   0x9   : > { %p40_p3 = scmp.ne.s32.totalorder %s807_s16, %s803_s15  ;;  %p41_p4 = scmp.eq.s32.totalorder %s876_s19, 0 }
   0xa   : > { %s892_s24 = scalar_select %p25_p1, %s811_s17, %s27_s22  }
   0xb   : > { %p894_p5 = por %p35_p2, %p34_p0  ;;  %p898_p6 = por %p41_p4, %p40_p3 }
   0xc   : > { %p127_p7 = scmp.eq.s32.totalorder %s876_s19, 1  ;;  %p133_p8 = scmp.eq.s32.totalorder %s599_s20, 1 }
   0xd   : > { %p638_p10 = scmp.lt.s32.totalorder %s815_s18, 2  ;;  %s162_s29 = sand.u32 1, %s811_s17  }
   0xe   : > { %p905_p11 = por %p127_p7, %p34_p0  ;;  %p909_p12 = por %p133_p8, %p40_p3 }
   0xf   : > { %s616_s30 = sshll.u32 %s815_s18, 7  ;;  %s602_s5 = sshll.u32 %s162_s29, 3 }
  0x10   : > { %s1172_s27 = scalar_select %p905_p11, 1, 0 }
  0x11   : > { %s1173_s28 = scalar_select %p909_p12, 1, 0 }
  0x12   : > { %s918_s8 = scalar_lea.hbm %s1164_s0, %s616_s30  ;;  %s166_s9 = scalar_lea.vmem [#allocation2], %s602_s5 }
  0x13   : > { %s174_s10 = sshll.u32 %s166_s9, 4  ;;  %p922_p13 = pnand %p638_p10, %p894_p5  ;;  %s926_s10 = int_to_ptr.vmem [resolvable:$true] %s174_s10 }
  0x14   : > { %s163_s12 = scalar_lea.sflag [#allocation3], %s162_s29  ;;  %s719_s13 = scalar_lea.hbm %s918_s8, 128 }
  0x15   : > { %p720_p2 = scmp.ne.s32.totalorder %s918_s8, %s719_s13  ;;  %p721_p3 = pneg %p922_p13 }
  0x16   : > { %s724_s22 = scalar_lea.hbm %s1164_s0, 256  ;;  %p725_p5 = scmp.lt.u32.totalorder %s918_s8, %s1164_s0 }
  0x17   : > { %p722_p4 = pnand %p721_p3, %p720_p2  ;;  %p726_p8 = scmp.lt.u32.totalorder %s724_s22, %s719_s13 }
  0x18   : > { %p728_p9 = scmp.lt.u32.totalorder %s719_s13, %s918_s8 }
  0x19   : > { %p723_p7 = pneg %p722_p4  ;;  %p727_p10 = por %p726_p8, %p725_p5 }
  0x1b   : > { %p729_p0 = por %p728_p9, %p727_p10 }
  0x1d   : > { %p730_p1 = pnand %p729_p0, %p723_p7 }
  0x1f   : > { %733 = shalt.err (!%p730_p1)
}
  0x20   : > { %s734_s29 = scalar_lea.vmem %s926_s10, 128  ;;  %s817_s30 = smov [#allocation2]  }
  0x21   : > { %p735_p2 = scmp.ne.s32.totalorder %s926_s10, %s734_s29  ;;  %s739_s5 = sshll.u32 %s817_s30, 4  ;;  %s740_s5 = int_to_ptr.vmem [resolvable:$false] %s739_s5 }
  0x22   : > { %s741_s6 = scalar_lea.vmem %s740_s5, 256  ;;  %p742_p11 = scmp.lt.s32.totalorder %s926_s10, %s740_s5 }
  0x23   : > { %p737_p4 = pnand %p735_p2, %p721_p3  ;;  %p743_p5 = scmp.lt.s32.totalorder %s741_s6, %s734_s29 }
  0x25   : > { %p738_p12 = pneg %p737_p4  ;;  %p744_p8 = por %p743_p5, %p742_p11 }
  0x27   : > { %p745_p9 = pnand %p744_p8, %p738_p12 }
  0x29   : > { %748 = shalt.err (!%p745_p9)
}
  0x2a   : > { %633 = dma.hbm_to_vmem [thread:$0]  (!%p922_p13), %s918_s8, 128, %s926_s10, %s163_s12  }
  0x2b   : > { %p1175_p0 = scmp.lt.s32.totalorder %s815_s18, 3  ;;  %p1176_p1 = scmp.ge.s32.totalorder %s815_s18, 1 }
  0x2d   : > { %p180_p3 = pnand %p1176_p1, %p1175_p0 }
  0x2e   : > { %s960_s7 = sand.u32 (!%p180_p3), 1, %s807_s16  }
  0x2f   : > { %183 = sbr.rel (%p180_p3) target bundleno = 570 (0x23a), region = 36  ;;  %s606_s9 = sshll.u32 (!%p180_p3), %s960_s7, 3 }
  0x30   : > { %s186_s13 = scalar_lea.sflag (!%p180_p3), [#allocation3], %s960_s7  ;;  %s189_s11 = scalar_lea.vmem (!%p180_p3), [#allocation2], %s606_s9 }
  0x36   : > { %794 = dma.done.wait (%p898_p6), %s186_s13, 128  }
  0x37   : > { %796 = vsyncadd (%p898_p6), %s186_s13, 4294967168  ;;  %v818_v0 = vmov 0   ;;  %v215_v1 = vld [vmem:[%s1165_s1] sm:$0xf]  ;;  %v819_v3 = vmov 839922192   ;;  %v223_v5 = vlaneseq }
  0x38   : > { %683 = vset.pattern.permute.xlu0 %v818_v0  ;;  %v229_v2 = vld [vmem:[%s1166_s2] sm:$0xf]  ;;  %v221_v4 = vunpack.c.l.s4 %v819_v3  ;;  %s820_s26 = smov 17   ;;  %s821_s20 = smov 1   ;;  %v828_v19 = vmov 0.0   ;;  %vm418_vm11 = vcmask 1043456  }
  0x39   : > { %218 = vperm.xlu0 %683, %v215_v1   ;;  %v224_v7 = vshrl.u32 %v223_v5, 7  ;;  %v214_v11 = vld [vmem:[%s189_s11] sm:$0xff]  ;;  %s822_s22 = smov 127   ;;  %s823_s23 = smov 16   ;;  %502 = vmatprep.mubr.f32.mxu0 %v828_v19  ;;  %v986_v20 = vand.u32 127, %v223_v5 }
  0x3a   : > { %v222_v6 = vunpack.c.0.s8 %v221_v4  ;;  %s824_s25 = smov 113   ;;  %s825_s29 = smov 15  }
  0x3b   : > { %s826_s30 = smov 111   ;;  %s827_s5 = smov 112   ;;  %v989_v21 = vadd.s32 128, %v986_v20  ;;  %v251_v22 = vand.u32 15, %v986_v20  ;;  %vm327_vm0 = vcmp.lt.s32.totalorder %v986_v20, 1  ;;  %vm340_vm1 = vcmp.lt.s32.totalorder %v986_v20, 127 }
  0x3c   : > { %v225_v8 = vsub.s32 %v222_v6, %v224_v7  ;;  %vm278_vm2 = vcmp.lt.s32.totalorder %v986_v20, 17  ;;  %vm297_vm3 = vcmp.lt.s32.totalorder %v986_v20, 16  ;;  %vm281_vm5 = vcmp.ge.s32.totalorder %v986_v20, 16  ;;  %s617_s11 = sshll.u32 %s876_s19, 7  ;;  %s213_s8 = scalar_lea.vmem [#allocation5], %s606_s9 }
  0x3d   : > { %232 = vperm.xlu0 %683, %v229_v2   ;;  %v258_v23 = vand.u32 15, %v989_v21  ;;  %vm1002_vm6 = vcmp.gt.s32.totalorder %v251_v22, 0  ;;  %vm353_vm7 = vcmp.lt.s32.totalorder %v986_v20, 113  ;;  %vm1009_vm8 = vcmp.lt.s32.totalorder %v251_v22, 15  ;;  %s529_s10 = sshll.u32 %s213_s8, 4  ;;  %p1189_p11 = scmp.ne.s32.totalorder %s1172_s27, 0  ;;  %s1122_s10 = int_to_ptr.vmem [resolvable:$true] %s529_s10 }
  0x3e   : > { %vm357_vm10 = vcmp.lt.s32.totalorder %v989_v21, 240  ;;  %vm370_vm12 = vcmp.lt.s32.totalorder %v986_v20, 112  ;;  %vm310_vm13 = vcmp.lt.s32.totalorder %v986_v20, 15  ;;  %vm1032_vm14 = vmand %vm281_vm5, %vm1002_vm6  ;;  %v427_v21 = vld [vmem:[%s1167_s3] sm:$0xf]  ;;  %s829_s19 = smov [#allocation5]  }
  0x3f   : > { %vm997_vm4 = vcmp.gt.s32.totalorder %v258_v23, 0  ;;  %vm1013_vm9 = vcmp.lt.s32.totalorder %v258_v23, 15  ;;  %vm1056_vm15 = vmand %vm281_vm5, %vm1009_vm8  ;;  %s753_s9 = sshll.u32 %s829_s19, 4  ;;  %s754_s9 = int_to_ptr.vmem [resolvable:$false] %s753_s9 }
  0x40   : > { %p756_p7 = scmp.lt.s32.totalorder %s1122_s10, %s754_s9 }
  0xb8   : > { %v219_v9 = vpop.permute.xlu0 %218 }
  0xb9   : > { %v226_v10 = vrot.slane %v219_v9, %v225_v8 }
  0xbb   : > { %v228_v13 = vmul.f32 %v226_v10, %v214_v11 }
  0xbc   : > { %v233_v12 = vpop.permute.xlu0 %232 }
  0xbd   : > { %v240_v14 = vrot.slane %v233_v12, %v225_v8 }
  0xbf   : > { %v242_v15 = vadd.f32 %v240_v14, %v228_v13 }
  0xc1   : > { %v976_v16 = vmax.f32 %v242_v15, 0.0 }
  0xc3   : > { %v980_v17 = vcombine.high %v976_v16, %v976_v16 }
  0xc5   : > { %v694_v18 = vpack.i.bf16 %v980_v17, %v976_v16 }
  0xc7   : > { %695 = vrot.lane.b32.xlu0 %v694_v18, %s820_s26  ;;  %685 = vrot.lane.b32.xlu1 %v694_v18, %s821_s20  ;;  %s1120_s26 = scalar_lea.hbm %s1168_s4, %s617_s11  ;;  %s515_s20 = scalar_lea.sflag [#allocation4], %s960_s7 }
  0xcb   : > { %705 = vrot.lane.b32.xlu0 %v694_v18, %s822_s22  ;;  %690 = vrot.lane.b32.xlu1 %v694_v18, %s823_s23  ;;  %s749_s22 = scalar_lea.vmem %s1122_s10, 128  ;;  %s755_s23 = scalar_lea.vmem %s754_s9, 256 }
  0xcc   : > { %p750_p6 = scmp.ne.s32.totalorder %s1122_s10, %s749_s22  ;;  %p757_p10 = scmp.lt.s32.totalorder %s755_s23, %s749_s22 }
  0xce   : > { %p751_p12 = pnand %p750_p6, %p1189_p11  ;;  %p758_p2 = por %p757_p10, %p756_p7 }
  0xcf   : > { %715 = vrot.lane.b32.xlu0 %v694_v18, %s824_s25  ;;  %700 = vrot.lane.b32.xlu1 %v694_v18, %s825_s29 }
  0xd0   : > { %p752_p13 = pneg %p751_p12 }
  0xd2   : > { %p759_p4 = pnand %p758_p2, %p752_p13 }
  0xd3   : > { %381 = vrot.lane.b32.xlu0 %v980_v17, %s826_s30  ;;  %710 = vrot.lane.b32.xlu1 %v694_v18, %s827_s5 }
  0xd7   : > { %379 = vrot.lane.b32.xlu1 %v976_v16, %s826_s30 }
 0x139   : > { %v696_v24 = vpop.permute.xlu0 %695  ;;  %v686_v25 = vpop.permute.xlu1 %685 }
 0x13a   : > { %v698_v26 = vunpack.i.h.bf16 %v696_v24  ;;  %v697_v27 = vunpack.i.l.bf16 %v696_v24  ;;  %v688_v28 = vunpack.i.h.bf16 %v686_v25  ;;  %v687_v29 = vunpack.i.l.bf16 %v686_v25 }
 0x13c   : > { %v328_v32 = vsel %vm327_vm0, %v687_v29, %v688_v28  ;;  %v329_v35 = vsel %vm327_vm0, %v688_v28, %v687_v29  ;;  %v279_v38 = vsel %vm278_vm2, %v697_v27, %v698_v26  ;;  %v280_v44 = vsel %vm278_vm2, %v698_v26, %v697_v27  ;;  %vm359_vm0 = vmand %vm357_vm10, %vm997_vm4 }
 0x13d   : > { %v706_v36 = vpop.permute.xlu0 %705  ;;  %v691_v37 = vpop.permute.xlu1 %690  ;;  %v335_v43 = vsel %vm997_vm4, %v328_v32, 0.0  ;;  %v292_v47 = vsel %vm997_vm4, %v279_v38, 0.0  ;;  %v334_v49 = vsel %vm1002_vm6, %v329_v35, 0.0  ;;  %v291_v59 = vsel %vm1032_vm14, %v280_v44, 0.0  ;;  %vm387_vm2 = vmand %vm357_vm10, %vm1013_vm9 }
 0x13e   : > { %v708_v39 = vunpack.i.h.bf16 %v706_v36  ;;  %v707_v40 = vunpack.i.l.bf16 %v706_v36  ;;  %v693_v41 = vunpack.i.h.bf16 %v691_v37  ;;  %v692_v42 = vunpack.i.l.bf16 %v691_v37 }
 0x13f   : > { %v403_v58 = vrot.slane %v335_v43, 4  ;;  %v402_v0 = vrot.slane %v334_v49, 4 }
 0x140   : > { %v299_v46 = vsel %vm297_vm3, %v693_v41, %v692_v42  ;;  %v298_v48 = vsel %vm297_vm3, %v692_v42, %v693_v41  ;;  %v341_v50 = vsel %vm340_vm1, %v707_v40, %v708_v39  ;;  %v342_v51 = vsel %vm340_vm1, %v708_v39, %v707_v40 }
 0x141   : > { %v716_v52 = vpop.permute.xlu0 %715  ;;  %v701_v53 = vpop.permute.xlu1 %700  ;;  %v397_v54 = vrot.slane %v298_v48, 4  ;;  %v304_v55 = vsel %vm281_vm5, %v299_v46, 0.0  ;;  %v347_v1 = vsel %vm1009_vm8, %v341_v50, 0.0  ;;  %v348_v2 = vsel %vm1013_vm9, %v342_v51, 0.0 }
 0x142   : > { %v703_v56 = vunpack.i.h.bf16 %v701_v53  ;;  %v702_v57 = vunpack.i.l.bf16 %v701_v53  ;;  %v718_v61 = vunpack.i.h.bf16 %v716_v52  ;;  %v717_v62 = vunpack.i.l.bf16 %v716_v52 }
 0x143   : > { %v396_v63 = vrot.slane %v304_v55, 4  ;;  %v420_v7 = vsel %vm418_vm11, %v292_v47, %v397_v54  ;;  %v409_v24 = vrot.slane %v348_v2, 4  ;;  %v408_v26 = vrot.slane %v347_v1, 4 }
 0x144   : > { %v311_v3 = vsel %vm310_vm13, %v702_v57, %v703_v56  ;;  %v312_v4 = vsel %vm310_vm13, %v703_v56, %v702_v57  ;;  %v354_v14 = vsel %vm353_vm7, %v717_v62, %v718_v61  ;;  %v355_v19 = vsel %vm353_vm7, %v718_v61, %v717_v62 }
 0x145   : > { %v711_v5 = vpop.permute.xlu1 %710  ;;  %v322_v6 = vsel %vm1013_vm9, %v311_v3, 0.0  ;;  %v321_v8 = vsel %vm1056_vm15, %v312_v4, 0.0  ;;  %v419_v9 = vsel %vm418_vm11, %v291_v59, %v396_v63  ;;  %vm383_vm1 = vcmp.lt.s32.totalorder %v986_v20, 111  ;;  %v382_v36 = vpop.permute.xlu0 %381 }
 0x146   : > { %v713_v10 = vunpack.i.h.bf16 %v711_v5  ;;  %v712_v11 = vunpack.i.l.bf16 %v711_v5  ;;  %v422_v12 = vsel %vm418_vm11, %v322_v6, %v403_v58  ;;  %v421_v13 = vsel %vm418_vm11, %v321_v8, %v402_v0 }
 0x147   : > { %v618_v15 = vpack.c.bf16 %v422_v12, %v420_v7  ;;  %v620_v18 = vpack.c.bf16 %v421_v13, %v419_v9  ;;  %v364_v32 = vsel %vm1002_vm6, %v354_v14, 0.0  ;;  %v365_v35 = vsel %vm359_vm0, %v355_v19, 0.0 }
 0x148   : > { %v371_v22 = vsel %vm370_vm12, %v712_v11, %v713_v10  ;;  %v372_v23 = vsel %vm370_vm12, %v713_v10, %v712_v11  ;;  %v424_v37 = vsel %vm418_vm11, %v980_v17, %v409_v24  ;;  %v423_v40 = vsel %vm418_vm11, %v976_v16, %v408_v26 }
 0x149   : > { %v414_v25 = vrot.slane %v371_v22, 4  ;;  %v378_v27 = vsel %vm357_vm10, %v372_v23, 0.0  ;;  %619 = vmatprep.subr.bf16.mxu0 %v618_v15  ;;  %v380_v28 = vpop.permute.xlu1 %379  ;;  %vm428_vm3 = vcmask 293888  }
 0x14a   : > { %v415_v29 = vrot.slane %v378_v27, 4  ;;  %621 = vmatpush1.bf16.msra.mxu0 %v620_v18  ;;  %v385_v31 = vsel %vm383_vm1, %v382_v36, %v380_v28  ;;  %v384_v17 = vsel %vm383_vm1, %v380_v28, %v382_v36 }
 0x14b   : > { %v425_v30 = vsel %vm418_vm11, %v364_v32, %v414_v25  ;;  %v393_v42 = vsel %vm387_vm2, %v385_v31, 0.0  ;;  %v392_v34 = vsel %vm1009_vm8, %v384_v17, 0.0 }
 0x14c   : > { %v426_v38 = vsel %vm418_vm11, %v365_v35, %v415_v29  ;;  %v624_v41 = vpack.c.bf16 %v425_v30, %v423_v40 }
 0x14d   : > { %v622_v39 = vpack.c.bf16 %v426_v38, %v424_v37 }
 0x14f   : > { %623 = vmatprep.subr.bf16.mxu0 %v622_v39 }
 0x150   : > { %625 = vmatpush1.bf16.msra.mxu0 %v624_v41 }
 0x151   : > { %608 = vmatprep.subr.msk.mxu0 %vm418_vm11, %v393_v42 }
 0x154   : > { %609 = vmatpush1.msk.msra.mxu0 %vm418_vm11, %v392_v34 }
 0x155   : > { %610 = vmatmul.mubr.msk.f32.vlgmr.msra.gmra.mrb[0].mxu0 %vm428_vm3, %v427_v21 }
 0x228   : > { %v504_v16 = vpop.f32.mrb[0].mxu0 }
 0x229   : > { %v506_v20 = vpop.f32.mrb[1].mxu0 }
 0x22a   : > { %v511_v43 = vcombine.low %v504_v16, %v506_v20 }
 0x22c   : > { %513 = vst [vmem:[%s213_s8] sm:$0xff] %v511_v43 }
 0x22d   : > { %762 = shalt.err (!%p759_p4)
}
 0x22e   : > { %s763_s7 = scalar_lea.hbm %s1120_s26, 128  ;;  %s767_s30 = scalar_lea.hbm %s1168_s4, 256 }
 0x22f   : > { %p764_p5 = scmp.ne.s32.totalorder %s1120_s26, %s763_s7  ;;  %p768_p0 = scmp.lt.u32.totalorder %s1120_s26, %s1168_s4 }
 0x230   : > { %p769_p1 = scmp.lt.u32.totalorder %s767_s30, %s763_s7  ;;  %p771_p6 = scmp.lt.u32.totalorder %s763_s7, %s1120_s26 }
 0x231   : > { %p765_p8 = pnand %p764_p5, %p1189_p11 }
 0x232   : > { %p770_p3 = por %p769_p1, %p768_p0 }
 0x233   : > { %p766_p9 = pneg %p765_p8 }
 0x234   : > { %p772_p12 = por %p771_p6, %p770_p3 }
 0x236   : > { %p773_p13 = pnand %p772_p12, %p766_p9 }
 0x238   : > { %776 = shalt.err (!%p773_p13)
}
 0x239   : > { %628 = dma.vmem_to_hbm [thread:$0]  (%p1189_p11), %s1122_s10, 128, %s1120_s26, %s515_s20  }
 0x23a PF: > { %s541_s13 = sand.u32 1, %s803_s15   ;;  %p1190_p7 = scmp.ne.s32.totalorder %s1173_s28, 0 }
 0x23b   : > { %p1191_p10 = scmp.ge.s32.totalorder %s815_s18, 2  ;;  %s542_s11 = scalar_lea.sflag [#allocation4], %s541_s13 }
 0x23d   : > { %p635_p2 = pnand %p1191_p10, %p1190_p7 }
 0x23f   : > { %798 = dma.done.wait (!%p635_p2), %s542_s11, 128  }
 0x240   : > { %800 = vsyncadd (!%p635_p2), %s542_s11, 4294967168  ;;  %p17_p4 = scmp.ge.s32.totalorder %s880_s21, 4   ;;  %s1192_s15 = smov %s807_s16 }
 0x241   : > { %s1193_s16 = smov %s811_s17  ;;  %s1194_s17 = smov %s892_s24 }
 0x242   : > { %s1195_s18 = smov %s880_s21  ;;  %19 = sbr.rel (!%p17_p4) target bundleno = 5 (0x5), region = 81 }
 0x249   :  { %547 = vsyncpa [#allocation3], 1 }
 0x24a   :  { %549 = vsyncpa [#allocation3 + $0x1], 1 }
 0x24b   :  { %550 = vsyncpa [#allocation4], 1 }
 0x24c   :  { %552 = vsyncpa [#allocation4 + $0x1], 1 }

</bundles_post_ra>
